<compile_context>
chip_gen: v5e
topology: v5e:2x2
jax: 0.10.0
libtpu: 0.0.40
codegen_flags: <defaults>
</compile_context>

<pallas_src>
import functools

import jax
import jax.numpy as jnp
from jax.experimental import pallas as pl
from jax.experimental.pallas import tpu as pltpu

_LANES = 128


def _ceil_to(a, m):
    return -(-a // m) * m


# ----------------------------------------------------------------------------
# Fused Pallas kernel: fc1 + ReLU + fc2 (whole Net.forward), one MC sample per grid step
# ----------------------------------------------------------------------------
def _net_kernel(x_ref, slab_ref, mix_ref, *rest, train, meta,
                hid1, rows1, rows2, rows1_pad, lanes):
    if train:
        eps_ref, o_ref = rest
    else:
        (o_ref,) = rest

    def ld(name, ncols=None):
        off, r, c = meta[name]                      # static python ints -> cheap ref slices
        return slab_ref[off:off + r, :(c if ncols is None else ncols)]

    def sivi_layer(idx, xin, noise, eps, n_out, apply_relu):
        p = lambda n, nc=None: ld(f"fc{idx}_{n}", nc)
        # --- SIVI mixing MLP: noise (d_in+1, sivi_in) -> per-weight mean matrix w_mu
        h1 = jnp.maximum(jnp.dot(noise, p("w1"),
                                 preferred_element_type=jnp.float32) + p("b1"), 0.0)
        h2 = jnp.maximum(jnp.dot(h1, p("w2"),
                                 preferred_element_type=jnp.float32) + p("b2"), 0.0)
        w_mu = jnp.dot(h2, p("w3", n_out),
                       preferred_element_type=jnp.float32) + p("b3", n_out)   # (d_in+1, n_out)
        d_in = xin.shape[1]
        # bias row folded in as a broadcast add (no [x, 1] concat)
        mean = (jnp.dot(xin, w_mu[:d_in, :], preferred_element_type=jnp.float32)
                + w_mu[d_in:d_in + 1, :])
        if train:
            sig2 = p("sig2", n_out)                 # exp(2*logsig), precomputed in wrapper
            var = (jnp.dot(xin * xin, sig2[:d_in, :],
                           preferred_element_type=jnp.float32)
                   + sig2[d_in:d_in + 1, :])
            # TODO(synk): verify the sqrt epsilon (1e-10) against the reference implementation.
            out = mean + jnp.sqrt(var + 1e-10) * eps
        else:
            out = mean
        return jnp.maximum(out, 0.0) if apply_relu else out

    x = x_ref[...]                                  # (B, din)
    mix = mix_ref[0]                                # (rows1_pad + rows2_pad, sivi_in)
    noise1 = mix[:rows1, :]
    noise2 = mix[rows1_pad:rows1_pad + rows2, :]
    if train:
        eps = eps_ref[0]                            # (B, 2*lanes)
        eps1 = eps[:, :hid1]
        eps2 = eps[:, lanes:2 * lanes]
    else:
        eps1 = eps2 = None

    h = sivi_layer(1, x, noise1, eps1, hid1, True)   # fc1 + Net's ReLU (stays in vregs)
    y = sivi_layer(2, h, noise2, eps2, lanes, False) # fc2, already 128-lane wide
    o_ref[0] = y.astype(o_ref.dtype)                 # single lane-dense store


# ----------------------------------------------------------------------------
# Wrapper (jitted): param-slab packing, wrapper-side noise, sample-parallel grid
# ----------------------------------------------------------------------------
@functools.partial(jax.jit, static_argnames=("train", "num_samples"))
def net_forward(x, params, key, train=True, num_samples=1):
    """Equivalent of Net.forward for `num_samples` MC samples -> (S, B, outdim)."""
    B = x.shape[0]
    x2 = x.reshape(B, -1).astype(jnp.float32)        # h = x.view(x.size(0), -1)
    din = x2.shape[1]
    p1, p2 = params["fc1"], params["fc2"]
    sivi_in = p1["w1"].shape[0]
    hid1 = p1["w3"].shape[1]
    outdim = p2["w3"].shape[1]
    rows1, rows2 = din + 1, hid1 + 1
    assert p1["logsig"].shape[0] == rows1 and p2["logsig"].shape[0] == rows2
    # din / hid1 multiples of 8 keep the in-kernel [:din] slices sublane-aligned
    # (true for the demo: 8 and 32); other values are still correct, just slower.

    # --- pack everything into one (8,128)-padded slab; sig2 precomputed here (not in-kernel)
    blocks = []
    for idx, p in ((1, p1), (2, p2)):
        sig2 = jnp.exp(2.0 * p["logsig"])
        for name, arr in (("w1", p["w1"]), ("b1", p["b1"]), ("w2", p["w2"]),
                          ("b2", p["b2"]), ("w3", p["w3"]), ("b3", p["b3"]),
                          ("sig2", sig2)):
            blocks.append((f"fc{idx}_{name}", arr))
    meta, parts, off = {}, [], 0
    for name, arr in blocks:
        r, c = arr.shape
        assert c <= _LANES, f"{name} has {c} > {_LANES} columns"
        rp = _ceil_to(r, 8)
        parts.append(jnp.pad(arr.astype(jnp.float32), ((0, rp - r), (0, _LANES - c))))
        meta[name] = (off, r, c)
        off += rp
    slab = jnp.concatenate(parts, axis=0)            # (total_rows, 128)

    # --- noise drawn wrapper-side (portable); one coalesced array per noise type
    rows1_pad, rows2_pad = _ceil_to(rows1, 8), _ceil_to(rows2, 8)
    S = num_samples
    k_mix, k_eps = jax.random.split(key)
    mix_noise = jax.random.normal(k_mix, (S, rows1_pad + rows2_pad, sivi_in), jnp.float32)

    inputs = [x2, slab, mix_noise]
    in_specs = [
        pl.BlockSpec((B, din), lambda s: (0, 0)),
        pl.BlockSpec(slab.shape, lambda s: (0, 0)),
        pl.BlockSpec((1, rows1_pad + rows2_pad, sivi_in), lambda s: (s, 0, 0)),
    ]
    if train:
        eps = jax.random.normal(k_eps, (S, B, 2 * _LANES), jnp.float32)
        inputs.append(eps)
        in_specs.append(pl.BlockSpec((1, B, 2 * _LANES), lambda s: (s, 0, 0)))

    kernel = functools.partial(
        _net_kernel, train=train, meta=meta, hid1=hid1,
        rows1=rows1, rows2=rows2, rows1_pad=rows1_pad, lanes=_LANES)

    extra = {}
    if jax.default_backend() == "tpu":
        extra["compiler_params"] = pltpu.CompilerParams(
            dimension_semantics=("parallel",))       # sample-parallel (v7x dual-TC)

    out_padded = pl.pallas_call(
        kernel,
        grid=(S,),
        in_specs=in_specs,
        out_specs=pl.BlockSpec((1, B, _LANES), lambda s: (s, 0, 0)),
        out_shape=jax.ShapeDtypeStruct((S, B, _LANES), jnp.float32),
        **extra,
    )(*inputs)
    return out_padded[:, :, :outdim]                 # slice the lane padding off


def net_forward_single(x, params, key, train=True):
    """Exact Net.forward equivalent: one MC sample -> (B, outdim)."""
    return net_forward(x, params, key, train=train, num_samples=1)[0]


# ----------------------------------------------------------------------------
# Parameter construction (deterministic, mirrors SIVI_bayes_layer.__init__)
# ----------------------------------------------------------------------------
def init_sivi_layer_params(key, in_dim, out_dim, sivi_input_dim, sivi_layer_size):
    rows = in_dim + 1  # weight matrix rows include the bias row
    k1, k2, k3 = jax.random.split(key, 3)
    return {
        "w1": 0.1 * jax.random.normal(k1, (sivi_input_dim, sivi_layer_size), jnp.float32),
        "b1": jnp.zeros((1, sivi_layer_size), jnp.float32),
        "w2": 0.1 * jax.random.normal(k2, (sivi_layer_size, sivi_layer_size), jnp.float32),
        "b2": jnp.zeros((1, sivi_layer_size), jnp.float32),
        "w3": 0.1 * jax.random.normal(k3, (sivi_layer_size, out_dim), jnp.float32),
        "b3": jnp.zeros((1, out_dim), jnp.float32),
        "logsig": jnp.full((rows, out_dim), -4.6, jnp.float32),
    }


def init_net_params(key, inputdim, layer_size, outputdim,
                    sivi_input_dim=10, sivi_layer_size=20):
    hid1, _hid2 = layer_size  # hid2 unused by Net.forward (fc2: hid1 -> outputdim)
    k1, k2 = jax.random.split(key, 2)
    return {
        "fc1": init_sivi_layer_params(k1, inputdim, hid1, sivi_input_dim, sivi_layer_size),
        "fc2": init_sivi_layer_params(k2, hid1, outputdim, sivi_input_dim, sivi_layer_size),
    }


# ----------------------------------------------------------------------------
# Demo
# ----------------------------------------------------------------------------
if __name__ == "__main__":
    key = jax.random.PRNGKey(0)
    k_param, k_data, k_fwd = jax.random.split(key, 3)

    # UCI-regression-like shapes: batch=2, 8 input features, layer_size=(32,32), scalar output.
    inputdim, layer_size, outputdim = 8, (32, 32), 1
    params = init_net_params(k_param, inputdim, layer_size, outputdim,
                             sivi_input_dim=10, sivi_layer_size=20)
    x = jax.random.normal(k_data, (2, inputdim), jnp.float32)

    # train=True path (stochastic: SIVI mixing noise + local-reparam eps)
    y_train = jax.block_until_ready(net_forward_single(x, params, k_fwd, train=True))
    # train=False path (deterministic mean; same weight sample for the same key)
    y_eval = jax.block_until_ready(net_forward_single(x, params, k_fwd, train=False))
    # sample-batched path exercising the sample-parallel grid
    y_mc = jax.block_until_ready(net_forward(x, params, k_fwd, train=True, num_samples=4))

    assert y_train.shape == (2, outputdim), y_train.shape
    assert y_eval.shape == (2, outputdim), y_eval.shape
    assert y_mc.shape == (4, 2, outputdim), y_mc.shape
    assert jnp.all(jnp.isfinite(y_train))
    assert jnp.all(jnp.isfinite(y_eval))
    assert jnp.all(jnp.isfinite(y_mc))
    print("KERNEL_OK")
</pallas_src>

<mosaic_0001>
module attributes {stable_mosaic.version = 11 : i64} {
  func.func @_net_kernel(%arg0: i32, %arg1: memref<2x8xf32, #tpu.memory_space<vmem>>, %arg2: memref<232x128xf32, #tpu.memory_space<vmem>>, %arg3: memref<1x56x10xf32, #tpu.memory_space<vmem>>, %arg4: memref<1x2x256xf32, #tpu.memory_space<vmem>>, %arg5: memref<1x2x128xf32, #tpu.memory_space<vmem>>) attributes {dimension_semantics = [#tpu.dimension_semantics<arbitrary>], iteration_bounds = array<i64: 1>, scalar_prefetch = 0 : i64, scratch_operands = 0 : i64, tpu.core_type = #tpu.core_type<tc>, window_params = [{pipeline_mode = #tpu.pipeline_mode<synchronous>, transform_indices = @transform_0, window_bounds = array<i64: 2, 8>}, {pipeline_mode = #tpu.pipeline_mode<synchronous>, transform_indices = @transform_1, window_bounds = array<i64: 232, 128>}, {transform_indices = @transform_2, window_bounds = array<i64: 1, 56, 10>}, {transform_indices = @transform_3, window_bounds = array<i64: 1, 2, 256>}, {transform_indices = @transform_4, window_bounds = array<i64: 1, 2, 128>}]} {
    %c0 = arith.constant 0 : index
    %c0_0 = arith.constant 0 : index
    %0 = vector.load %arg1[%c0, %c0_0] : memref<2x8xf32, #tpu.memory_space<vmem>>, vector<2x8xf32>
    %c0_1 = arith.constant 0 : index
    %c0_2 = arith.constant 0 : index
    %c0_3 = arith.constant 0 : index
    %1 = vector.load %arg3[%c0_1, %c0_2, %c0_3] : memref<1x56x10xf32, #tpu.memory_space<vmem>>, vector<1x56x10xf32>
    %2 = vector.shape_cast %1 : vector<1x56x10xf32> to vector<56x10xf32>
    %3 = vector.extract_strided_slice %2 {offsets = [0, 0], sizes = [9, 10], strides = [1, 1]} : vector<56x10xf32> to vector<9x10xf32>
    %4 = vector.extract_strided_slice %2 {offsets = [16, 0], sizes = [33, 10], strides = [1, 1]} : vector<56x10xf32> to vector<33x10xf32>
    %c0_4 = arith.constant 0 : index
    %c0_5 = arith.constant 0 : index
    %c0_6 = arith.constant 0 : index
    %5 = vector.load %arg4[%c0_4, %c0_5, %c0_6] : memref<1x2x256xf32, #tpu.memory_space<vmem>>, vector<1x2x256xf32>
    %6 = vector.shape_cast %5 : vector<1x2x256xf32> to vector<2x256xf32>
    %7 = vector.extract_strided_slice %6 {offsets = [0, 0], sizes = [2, 32], strides = [1, 1]} : vector<2x256xf32> to vector<2x32xf32>
    %8 = vector.extract_strided_slice %6 {offsets = [0, 128], sizes = [2, 128], strides = [1, 1]} : vector<2x256xf32> to vector<2x128xf32>
    %c0_7 = arith.constant 0 : index
    %c0_8 = arith.constant 0 : index
    %9 = vector.load %arg2[%c0_7, %c0_8] : memref<232x128xf32, #tpu.memory_space<vmem>>, vector<10x20xf32>
    %cst = arith.constant dense<0.000000e+00> : vector<9x20xf32>
    %10 = tpu.matmul %3, %9, %cst {dimension_numbers = #tpu.dot_dimension_numbers<[1], [0], [0], [1], [0, 0, 1, 1], [], []>} : vector<9x10xf32>, vector<10x20xf32>, vector<9x20xf32> -> vector<9x20xf32>
    %c16 = arith.constant 16 : index
    %c0_9 = arith.constant 0 : index
    %11 = vector.load %arg2[%c16, %c0_9] : memref<232x128xf32, #tpu.memory_space<vmem>>, vector<1x20xf32>
    %12 = vector.broadcast %11 : vector<1x20xf32> to vector<9x20xf32>
    %13 = arith.addf %10, %12 : vector<9x20xf32>
    %cst_10 = arith.constant 0.000000e+00 : f32
    %14 = vector.broadcast %cst_10 : f32 to vector<9x20xf32>
    %15 = arith.maximumf %13, %14 : vector<9x20xf32>
    %c24 = arith.constant 24 : index
    %c0_11 = arith.constant 0 : index
    %16 = vector.load %arg2[%c24, %c0_11] : memref<232x128xf32, #tpu.memory_space<vmem>>, vector<20x20xf32>
    %cst_12 = arith.constant dense<0.000000e+00> : vector<9x20xf32>
    %17 = tpu.matmul %15, %16, %cst_12 {dimension_numbers = #tpu.dot_dimension_numbers<[1], [0], [0], [1], [0, 0, 1, 1], [], []>} : vector<9x20xf32>, vector<20x20xf32>, vector<9x20xf32> -> vector<9x20xf32>
    %c48 = arith.constant 48 : index
    %c0_13 = arith.constant 0 : index
    %18 = vector.load %arg2[%c48, %c0_13] : memref<232x128xf32, #tpu.memory_space<vmem>>, vector<1x20xf32>
    %19 = vector.broadcast %18 : vector<1x20xf32> to vector<9x20xf32>
    %20 = arith.addf %17, %19 : vector<9x20xf32>
    %cst_14 = arith.constant 0.000000e+00 : f32
    %21 = vector.broadcast %cst_14 : f32 to vector<9x20xf32>
    %22 = arith.maximumf %20, %21 : vector<9x20xf32>
    %c56 = arith.constant 56 : index
    %c0_15 = arith.constant 0 : index
    %23 = vector.load %arg2[%c56, %c0_15] : memref<232x128xf32, #tpu.memory_space<vmem>>, vector<20x32xf32>
    %cst_16 = arith.constant dense<0.000000e+00> : vector<9x32xf32>
    %24 = tpu.matmul %22, %23, %cst_16 {dimension_numbers = #tpu.dot_dimension_numbers<[1], [0], [0], [1], [0, 0, 1, 1], [], []>} : vector<9x20xf32>, vector<20x32xf32>, vector<9x32xf32> -> vector<9x32xf32>
    %c80 = arith.constant 80 : index
    %c0_17 = arith.constant 0 : index
    %25 = vector.load %arg2[%c80, %c0_17] : memref<232x128xf32, #tpu.memory_space<vmem>>, vector<1x32xf32>
    %26 = vector.broadcast %25 : vector<1x32xf32> to vector<9x32xf32>
    %27 = arith.addf %24, %26 : vector<9x32xf32>
    %28 = vector.extract_strided_slice %27 {offsets = [0, 0], sizes = [8, 32], strides = [1, 1]} : vector<9x32xf32> to vector<8x32xf32>
    %cst_18 = arith.constant dense<0.000000e+00> : vector<2x32xf32>
    %29 = tpu.matmul %0, %28, %cst_18 {dimension_numbers = #tpu.dot_dimension_numbers<[1], [0], [0], [1], [0, 0, 1, 1], [], []>} : vector<2x8xf32>, vector<8x32xf32>, vector<2x32xf32> -> vector<2x32xf32>
    %30 = vector.extract_strided_slice %27 {offsets = [8, 0], sizes = [1, 32], strides = [1, 1]} : vector<9x32xf32> to vector<1x32xf32>
    %31 = vector.broadcast %30 : vector<1x32xf32> to vector<2x32xf32>
    %32 = arith.addf %29, %31 : vector<2x32xf32>
    %c88 = arith.constant 88 : index
    %c0_19 = arith.constant 0 : index
    %33 = vector.load %arg2[%c88, %c0_19] : memref<232x128xf32, #tpu.memory_space<vmem>>, vector<9x32xf32>
    %34 = arith.mulf %0, %0 : vector<2x8xf32>
    %35 = vector.extract_strided_slice %33 {offsets = [0, 0], sizes = [8, 32], strides = [1, 1]} : vector<9x32xf32> to vector<8x32xf32>
    %cst_20 = arith.constant dense<0.000000e+00> : vector<2x32xf32>
    %36 = tpu.matmul %34, %35, %cst_20 {dimension_numbers = #tpu.dot_dimension_numbers<[1], [0], [0], [1], [0, 0, 1, 1], [], []>} : vector<2x8xf32>, vector<8x32xf32>, vector<2x32xf32> -> vector<2x32xf32>
    %37 = vector.extract_strided_slice %33 {offsets = [8, 0], sizes = [1, 32], strides = [1, 1]} : vector<9x32xf32> to vector<1x32xf32>
    %38 = vector.broadcast %37 : vector<1x32xf32> to vector<2x32xf32>
    %39 = arith.addf %36, %38 : vector<2x32xf32>
    %cst_21 = arith.constant 1.000000e-10 : f32
    %40 = vector.broadcast %cst_21 : f32 to vector<2x32xf32>
    %41 = arith.addf %39, %40 : vector<2x32xf32>
    %42 = math.sqrt %41 : vector<2x32xf32>
    %43 = arith.mulf %42, %7 : vector<2x32xf32>
    %44 = arith.addf %32, %43 : vector<2x32xf32>
    %cst_22 = arith.constant 0.000000e+00 : f32
    %45 = vector.broadcast %cst_22 : f32 to vector<2x32xf32>
    %46 = arith.maximumf %44, %45 : vector<2x32xf32>
    %c104 = arith.constant 104 : index
    %c0_23 = arith.constant 0 : index
    %47 = vector.load %arg2[%c104, %c0_23] : memref<232x128xf32, #tpu.memory_space<vmem>>, vector<10x20xf32>
    %cst_24 = arith.constant dense<0.000000e+00> : vector<33x20xf32>
    %48 = tpu.matmul %4, %47, %cst_24 {dimension_numbers = #tpu.dot_dimension_numbers<[1], [0], [0], [1], [0, 0, 1, 1], [], []>} : vector<33x10xf32>, vector<10x20xf32>, vector<33x20xf32> -> vector<33x20xf32>
    %c120 = arith.constant 120 : index
    %c0_25 = arith.constant 0 : index
    %49 = vector.load %arg2[%c120, %c0_25] : memref<232x128xf32, #tpu.memory_space<vmem>>, vector<1x20xf32>
    %50 = vector.broadcast %49 : vector<1x20xf32> to vector<33x20xf32>
    %51 = arith.addf %48, %50 : vector<33x20xf32>
    %cst_26 = arith.constant 0.000000e+00 : f32
    %52 = vector.broadcast %cst_26 : f32 to vector<33x20xf32>
    %53 = arith.maximumf %51, %52 : vector<33x20xf32>
    %c128 = arith.constant 128 : index
    %c0_27 = arith.constant 0 : index
    %54 = vector.load %arg2[%c128, %c0_27] : memref<232x128xf32, #tpu.memory_space<vmem>>, vector<20x20xf32>
    %cst_28 = arith.constant dense<0.000000e+00> : vector<33x20xf32>
    %55 = tpu.matmul %53, %54, %cst_28 {dimension_numbers = #tpu.dot_dimension_numbers<[1], [0], [0], [1], [0, 0, 1, 1], [], []>} : vector<33x20xf32>, vector<20x20xf32>, vector<33x20xf32> -> vector<33x20xf32>
    %c152 = arith.constant 152 : index
    %c0_29 = arith.constant 0 : index
    %56 = vector.load %arg2[%c152, %c0_29] : memref<232x128xf32, #tpu.memory_space<vmem>>, vector<1x20xf32>
    %57 = vector.broadcast %56 : vector<1x20xf32> to vector<33x20xf32>
    %58 = arith.addf %55, %57 : vector<33x20xf32>
    %cst_30 = arith.constant 0.000000e+00 : f32
    %59 = vector.broadcast %cst_30 : f32 to vector<33x20xf32>
    %60 = arith.maximumf %58, %59 : vector<33x20xf32>
    %c160 = arith.constant 160 : index
    %c0_31 = arith.constant 0 : index
    %61 = vector.load %arg2[%c160, %c0_31] : memref<232x128xf32, #tpu.memory_space<vmem>>, vector<20x128xf32>
    %cst_32 = arith.constant dense<0.000000e+00> : vector<33x128xf32>
    %62 = tpu.matmul %60, %61, %cst_32 {dimension_numbers = #tpu.dot_dimension_numbers<[1], [0], [0], [1], [0, 0, 1, 1], [], []>} : vector<33x20xf32>, vector<20x128xf32>, vector<33x128xf32> -> vector<33x128xf32>
    %c184 = arith.constant 184 : index
    %c0_33 = arith.constant 0 : index
    %63 = vector.load %arg2[%c184, %c0_33] : memref<232x128xf32, #tpu.memory_space<vmem>>, vector<1x128xf32>
    %64 = vector.broadcast %63 : vector<1x128xf32> to vector<33x128xf32>
    %65 = arith.addf %62, %64 : vector<33x128xf32>
    %66 = vector.extract_strided_slice %65 {offsets = [0, 0], sizes = [32, 128], strides = [1, 1]} : vector<33x128xf32> to vector<32x128xf32>
    %cst_34 = arith.constant dense<0.000000e+00> : vector<2x128xf32>
    %67 = tpu.matmul %46, %66, %cst_34 {dimension_numbers = #tpu.dot_dimension_numbers<[1], [0], [0], [1], [0, 0, 1, 1], [], []>} : vector<2x32xf32>, vector<32x128xf32>, vector<2x128xf32> -> vector<2x128xf32>
    %68 = vector.extract_strided_slice %65 {offsets = [32, 0], sizes = [1, 128], strides = [1, 1]} : vector<33x128xf32> to vector<1x128xf32>
    %69 = vector.broadcast %68 : vector<1x128xf32> to vector<2x128xf32>
    %70 = arith.addf %67, %69 : vector<2x128xf32>
    %c192 = arith.constant 192 : index
    %c0_35 = arith.constant 0 : index
    %71 = vector.load %arg2[%c192, %c0_35] : memref<232x128xf32, #tpu.memory_space<vmem>>, vector<33x128xf32>
    %72 = arith.mulf %46, %46 : vector<2x32xf32>
    %73 = vector.extract_strided_slice %71 {offsets = [0, 0], sizes = [32, 128], strides = [1, 1]} : vector<33x128xf32> to vector<32x128xf32>
    %cst_36 = arith.constant dense<0.000000e+00> : vector<2x128xf32>
    %74 = tpu.matmul %72, %73, %cst_36 {dimension_numbers = #tpu.dot_dimension_numbers<[1], [0], [0], [1], [0, 0, 1, 1], [], []>} : vector<2x32xf32>, vector<32x128xf32>, vector<2x128xf32> -> vector<2x128xf32>
    %75 = vector.extract_strided_slice %71 {offsets = [32, 0], sizes = [1, 128], strides = [1, 1]} : vector<33x128xf32> to vector<1x128xf32>
    %76 = vector.broadcast %75 : vector<1x128xf32> to vector<2x128xf32>
    %77 = arith.addf %74, %76 : vector<2x128xf32>
    %cst_37 = arith.constant 1.000000e-10 : f32
    %78 = vector.broadcast %cst_37 : f32 to vector<2x128xf32>
    %79 = arith.addf %77, %78 : vector<2x128xf32>
    %80 = math.sqrt %79 : vector<2x128xf32>
    %81 = arith.mulf %80, %8 : vector<2x128xf32>
    %82 = arith.addf %70, %81 : vector<2x128xf32>
    %c0_38 = arith.constant 0 : index
    %c0_39 = arith.constant 0 : index
    %c0_40 = arith.constant 0 : index
    %83 = vector.load %arg5[%c0_38, %c0_39, %c0_40] : memref<1x2x128xf32, #tpu.memory_space<vmem>>, vector<1x2x128xf32>
    %84 = vector.shape_cast %83 : vector<1x2x128xf32> to vector<2x128xf32>
    %85 = vector.shape_cast %82 : vector<2x128xf32> to vector<1x2x128xf32>
    tpu.vector_store %arg5[%c0_38, %c0_39, %c0_40], %85 {strides = array<i32>} : memref<1x2x128xf32, #tpu.memory_space<vmem>>, vector<1x2x128xf32>,
    return
  }
  func.func @transform_0(%arg0: i32) -> (i32, i32) {
    %c0_i32 = arith.constant 0 : i32
    %c0_i32_0 = arith.constant 0 : i32
    %c0_i32_1 = arith.constant 0 : i32
    return %c0_i32, %c0_i32_0 : i32, i32
  }
  func.func @transform_1(%arg0: i32) -> (i32, i32) {
    %c0_i32 = arith.constant 0 : i32
    %c0_i32_0 = arith.constant 0 : i32
    %c0_i32_1 = arith.constant 0 : i32
    return %c0_i32, %c0_i32_0 : i32, i32
  }
  func.func @transform_2(%arg0: i32) -> (i32, i32, i32) {
    %c0_i32 = arith.constant 0 : i32
    %c0_i32_0 = arith.constant 0 : i32
    %c0_i32_1 = arith.constant 0 : i32
    return %arg0, %c0_i32, %c0_i32_0 : i32, i32, i32
  }
  func.func @transform_3(%arg0: i32) -> (i32, i32, i32) {
    %c0_i32 = arith.constant 0 : i32
    %c0_i32_0 = arith.constant 0 : i32
    %c0_i32_1 = arith.constant 0 : i32
    return %arg0, %c0_i32, %c0_i32_0 : i32, i32, i32
  }
  func.func @transform_4(%arg0: i32) -> (i32, i32, i32) {
    %c0_i32 = arith.constant 0 : i32
    %c0_i32_0 = arith.constant 0 : i32
    %c0_i32_1 = arith.constant 0 : i32
    return %arg0, %c0_i32, %c0_i32_0 : i32, i32, i32
  }
}

</mosaic_0001>

<bundles_post_ra>
// kernel: net_forward.3
= control target key start
LH: loop header
LB: loop body
LE: loop exit
PB: predicated region body
PF: predicated region fallthrough
CT: control target
= control target key end

     0   :  { %vm37_vm0 = vcmask 1041408   ;;  %vm30_vm1 = vcmask 80896   ;;  %vm78_vm2 = vcmask 1043456   ;;  %vm71_vm3 = vcmask 162816   ;;  %s680_s1 = inlined_call_operand.vmem [shape: f32[232,128], index: 1, kind: input, shape index: {}]   ;;  %s681_s2 = inlined_call_operand.vmem [shape: f32[1,56,10], index: 2, kind: input, shape index: {}]   ;;  %s682_s0 = inlined_call_operand.vmem [shape: f32[2,8], index: 0, kind: input, shape index: {}]   ;;  %s683_s3 = inlined_call_operand.vmem [shape: f32[1,2,256], index: 3, kind: input, shape index: {}]   ;;  %s684_s4 = inlined_call_operand.vmem [shape: f32[1,2,128], index: 4, kind: output, shape index: {}]  }
   0x1   :  { %v27_v0 = vld [vmem:[%s680_s1 + $0x8] sm:$0x3]  ;;  %v26_v1 = vld [vmem:[%s680_s1] sm:$0xff]  ;;  %v66_v6 = vld [vmem:[%s680_s1 + $0x18] sm:$0xff]  ;;  %vm145_vm4 = vcmask 64512   ;;  %vm387_vm7 = vcmask 261120  }
   0x2   :  { %465 = vmatpush.msk.msra.mxu0 %vm37_vm0, %v27_v0  ;;  %v18_v2 = vld [vmem:[%s681_s2] sm:$0xff]  ;;  %496 = vmatpush.msk.msra.mxu1 %vm37_vm0, %v27_v0  ;;  %v68_v3 = vld [vmem:[%s680_s1 + $0x28] sm:$0xf]  ;;  %v498_v7 = vld [vmem:[%s680_s1 + $0x10] ss:$0 sm:$0xff] }
   0x3   :  { %468 = vmatpush.msk.msra.mxu2 %vm78_vm2, %v68_v3  ;;  %v67_v4 = vld [vmem:[%s680_s1 + $0x20] sm:$0xff]  ;;  %v19_v5 = vld [vmem:[%s681_s2 + $0x8] sm:$0xff]  ;;  %v107_v16 = vld [vmem:[%s680_s1 + $0x38] sm:$0xff] }
   0x4   :  { %56 = vmatpush.msra.mxu0 %v26_v1  ;;  %497 = vmatpush.msra.mxu1 %v26_v1  ;;  %v109_v11 = vld [vmem:[%s680_s1 + $0x48] sm:$0xf]  ;;  %v108_v15 = vld [vmem:[%s680_s1 + $0x40] sm:$0xff]  ;;  %v499_v17 = vld [vmem:[%s680_s1 + $0x30] ss:$0 sm:$0xff] }
   0x5   :  { %466 = vmatmul.msk.f32.vlgmr.msra.gmra.mxu0 %vm30_vm1, %v18_v2  ;;  %96 = vmatpush.msra.mxu2 %v67_v4  ;;  %v500_v24 = vld [vmem:[%s680_s1 + $0x50] ss:$0 sm:$0xff]  ;;  %v17_v27 = vld [vmem:[%s682_s0] sm:$0x3]  ;;  %v169_v28 = vld [vmem:[%s680_s1 + $0x58] sm:$0xff] }
   0x6   :  { %467 = vmatmul.msk.f32.vlgmr.msra.gmra.mxu1 %vm30_vm1, %v19_v5  ;;  %v213_v29 = vld [vmem:[%s680_s1 + $0x70] sm:$0x3]  ;;  %v212_v30 = vld [vmem:[%s680_s1 + $0x68] sm:$0xff]  ;;  %v171_v31 = vmul.f32 %v17_v27, %v17_v27  ;;  %v21_v33 = vld [vmem:[%s681_s2 + $0x18] sm:$0xff] }
   0x7   :  { %97 = vmatpush.msra.mxu2 %v66_v6  ;;  %v20_v32 = vld [vmem:[%s681_s2 + $0x10] sm:$0xff]  ;;  %v22_v34 = vld [vmem:[%s681_s2 + $0x20] sm:$0xff]  ;;  %v23_v35 = vld [vmem:[%s681_s2 + $0x28] sm:$0xff] }
   0x8   :  { %v273_v36 = vld [vmem:[%s680_s1 + $0x90] sm:$0xf]  ;;  %v272_v37 = vld [vmem:[%s680_s1 + $0x88] sm:$0xff]  ;;  %v271_v38 = vld [vmem:[%s680_s1 + $0x80] sm:$0xff] }
   0x9   :  { %471 = vmatpush.msk.msrb.mxu2 %vm78_vm2, %v109_v11  ;;  %482 = vmatpush.msk.msrb.mxu0 %vm78_vm2, %v273_v36  ;;  %v25_v40 = vld [vmem:[%s683_s3] sm:$0xf]  ;;  %v502_v45 = vld [vmem:[%s680_s1 + $0x78] ss:$0 sm:$0xff]  ;;  %v24_v46 = vld [vmem:[%s681_s2 + $0x30] sm:$0xff] }
   0xa   :  { %455 = vst [vmem:[#allocation1] ss:$4 sm:$0xff] %v25_v40  ;;  %v501_v41 = vld [vmem:[%s680_s1 + $0x60] ss:$0 sm:$0xff]  ;;  %v333_v11 = vld [vmem:[%s680_s1 + $0xb0] sm:$0xf] }
   0xb   :  { %135 = vmatpush.msrb.mxu2 %v108_v15  ;;  %308 = vmatpush.msrb.mxu0 %v272_v37  ;;  %v504_v36 = vld [vmem:[%s680_s1 + $0xb8] ss:$0 sm:$0xff] }
   0xc   :  { %488 = vmatpush.msk.msrb.mxu1 %vm78_vm2, %v333_v11 }
   0xd   :  { %136 = vmatpush.msrb.mxu2 %v107_v16  ;;  %309 = vmatpush.msrb.mxu0 %v271_v38 }
  0x82   :  { %v58_v8 = vpop.f32.mrf.mxu0 }
  0x83   :  { %v59_v9 = vadd.f32 %v498_v7, %v58_v8  ;;  %v61_v12 = vpop.f32.mrf.mxu1 }
  0x84   :  { %v62_v13 = vadd.f32 %v498_v7, %v61_v12  ;;  %v332_v12 = vld [vmem:[%s680_s1 + $0xa8] sm:$0xff] }
  0x85   :  { %v64_v10 = vmax.f32 %v59_v9, 0.0  ;;  %368 = vmatpush.msrb.mxu1 %v332_v12 }
  0x86   :  { %v65_v14 = vmax.f32 %v62_v13, 0.0  ;;  %v331_v13 = vld [vmem:[%s680_s1 + $0xa0] sm:$0xff] }
  0x87   :  { %469 = vmatmul.msk.f32.vlgmr.msra.gmra.mxu2 %vm71_vm3, %v64_v10  ;;  %369 = vmatpush.msrb.mxu1 %v331_v13 }
  0x8f   :  { %470 = vmatmul.msk.f32.gmra.mxu2 %vm71_vm3, %v65_v14  ;;  %v503_v14 = vld [vmem:[%s680_s1 + $0x98] ss:$0 sm:$0xff] }
 0x10a   :  { %v99_v18 = vpop.f32.mrf.mxu2 }
 0x10b   :  { %v100_v19 = vadd.f32 %v499_v17, %v99_v18 }
 0x10d   :  { %v105_v20 = vmax.f32 %v100_v19, 0.0 }
 0x10f   :  { %472 = vmatmul.msk.f32.vlgmr.msrb.gmra.mxu2 %vm71_vm3, %v105_v20 }
 0x112   :  { %v102_v21 = vpop.f32.mrf.mxu2 }
 0x113   :  { %v103_v22 = vadd.f32 %v499_v17, %v102_v21 }
 0x115   :  { %v106_v23 = vmax.f32 %v103_v22, 0.0 }
 0x117   :  { %473 = vmatmul.msk.f32.gmra.mxu2 %vm71_vm3, %v106_v23 }
 0x192   :  { %v138_v25 = vpop.f32.mrf.mxu2 }
 0x193   :  { %v139_v26 = vadd.f32 %v500_v24, %v138_v25 }
 0x195   :  { %164 = vmatpush.msra.mxu3 %v139_v26 }
 0x196   :  { %474 = vmatmul.msk.f32.vlgmr.msra.gmra.mxu3 %vm145_vm4, %v17_v27 }
 0x197   :  { %191 = vmatpush.msrb.mxu3 %v169_v28 }
 0x199   :  { %476 = vmatpush.msk.msra.mxu3 %vm37_vm0, %v213_v29 }
 0x19a   :  { %v141_v55 = vpop.f32.mrf.mxu2 }
 0x19b   :  { %249 = vmatpush.msra.mxu3 %v212_v30  ;;  %v142_v59 = vadd.f32 %v500_v24, %v141_v55 }
 0x19d   :  { %v144_v63 = vperm.slane %v142_v59, 0 }
 0x19e   :  { %475 = vmatmul.msk.f32.vlgmr.msrb.gmra.mxu3 %vm145_vm4, %v171_v31 }
 0x1a6   :  { %477 = vmatmul.msk.f32.vlgmr.msra.gmra.mxu3 %vm30_vm1, %v20_v32 }
 0x1ae   :  { %478 = vmatmul.msk.f32.gmra.mxu3 %vm30_vm1, %v21_v33 }
 0x1b6   :  { %479 = vmatmul.msk.f32.gmra.mxu3 %vm30_vm1, %v22_v34 }
 0x1be   :  { %480 = vmatmul.msk.f32.gmra.mxu3 %vm30_vm1, %v23_v35 }
 0x1c6   :  { %481 = vmatmul.msk.f32.gmra.mxu3 %vm30_vm1, %v24_v46  ;;  %v411_v46 = vld [vmem:[%s680_s1 + $0xc0] sm:$0xff] }
 0x219   :  { %v166_v39 = vpop.f32.mrf.mxu3 }
 0x21a   :  { %v167_v4 = vadd.f32 %v166_v39, %v144_v63 }
 0x221   :  { %v193_v42 = vpop.f32.mrf.mxu3 }
 0x222   :  { %v194_v43 = vadd.f32 %v501_v41, %v193_v42 }
 0x224   :  { %v196_v44 = vadd.f32 1e-10, %v194_v43  ;;  %v414_v43 = vld [vmem:[%s680_s1 + $0xd8] sm:$0xff] }
 0x226   :  { %506 = vrsqrt.f32 %v196_v44  ;;  %vm204_vm5 = vcmp.eq.f32.partialorder %v196_v44, inf  ;;  %v207_v62 = vand.u32 2147483648, %v196_v44  ;;  %vm206_vm6 = vcmp.eq.f32.partialorder %v196_v44, 0.0 }
 0x229   :  { %v251_v47 = vpop.f32.mrf.mxu3 }
 0x22a   :  { %v252_v48 = vadd.f32 %v502_v45, %v251_v47 }
 0x22c   :  { %v507_v49 = vpop.eup %506  ;;  %v266_v50 = vmax.f32 %v252_v48, 0.0 }
 0x22d   :  { %v198_v51 = vmul.f32 %v507_v49, %v196_v44 }
 0x22e   :  { %483 = vmatmul.msk.f32.vlgmr.msrb.gmra.mxu0 %vm71_vm3, %v266_v50 }
 0x22f   :  { %v199_v52 = vmul.f32 %v507_v49, %v198_v51 }
 0x231   :  { %v254_v53 = vpop.f32.mrf.mxu3  ;;  %v200_v54 = vmul.f32 0.5, %v199_v52 }
 0x232   :  { %v255_v56 = vadd.f32 %v502_v45, %v254_v53 }
 0x233   :  { %v201_v57 = vsub.f32 1.5, %v200_v54 }
 0x234   :  { %v267_v58 = vmax.f32 %v255_v56, 0.0 }
 0x235   :  { %v202_v60 = vmul.f32 %v507_v49, %v201_v57  ;;  %v505_v49 = vld [vmem:[%s680_s1 + $0xe0] ss:$0 sm:$0xff] }
 0x236   :  { %484 = vmatmul.msk.f32.gmra.mxu0 %vm71_vm3, %v267_v58 }
 0x237   :  { %v203_v61 = vmul.f32 %v202_v60, %v196_v44 }
 0x239   :  { %v257_v0 = vpop.f32.mrf.mxu3  ;;  %v205_v1 = vsel %vm204_vm5, %v196_v44, %v203_v61  ;;  %v413_v44 = vld [vmem:[%s680_s1 + $0xd0] sm:$0xff] }
 0x23a   :  { %v258_v2 = vadd.f32 %v502_v45, %v257_v0  ;;  %v208_v3 = vsel %vm206_vm6, %v207_v62, %v205_v1  ;;  %v456_v0 = vld.sshfl [vmem:[#allocation1 + $0x8] sm:$0xff pattern:$0x73625140] }
 0x23b   :  { %v209_v5 = vmul.f32 %v208_v3, %v25_v40 }
 0x23c   :  { %v268_v6 = vmax.f32 %v258_v2, 0.0 }
 0x23d   :  { %v210_v7 = vadd.f32 %v209_v5, %v167_v4 }
 0x23e   :  { %485 = vmatmul.msk.f32.gmra.mxu0 %vm71_vm3, %v268_v6 }
 0x23f   :  { %v211_v42 = vmax.f32 %v210_v7, 0.0 }
 0x241   :  { %v260_v8 = vpop.f32.mrf.mxu3  ;;  %v416_v47 = vmul.f32 %v211_v42, %v211_v42 }
 0x242   :  { %v261_v9 = vadd.f32 %v502_v45, %v260_v8 }
 0x244   :  { %v269_v10 = vmax.f32 %v261_v9, 0.0 }
 0x246   :  { %486 = vmatmul.msk.f32.gmra.mxu0 %vm71_vm3, %v269_v10 }
 0x249   :  { %v263_v15 = vpop.f32.mrf.mxu3 }
 0x24a   :  { %v264_v17 = vadd.f32 %v502_v45, %v263_v15  ;;  %v412_v45 = vld [vmem:[%s680_s1 + $0xc8] sm:$0xff] }
 0x24c   :  { %v270_v19 = vmax.f32 %v264_v17, 0.0 }
 0x24e   :  { %487 = vmatmul.msk.f32.gmra.mxu0 %vm71_vm3, %v270_v19 }
 0x2ab   :  { %v311_v16 = vpop.f32.mrf.mxu0 }
 0x2ac   :  { %v312_v18 = vadd.f32 %v503_v14, %v311_v16 }
 0x2ae   :  { %v326_v20 = vmax.f32 %v312_v18, 0.0 }
 0x2b0   :  { %489 = vmatmul.msk.f32.vlgmr.msrb.gmra.mxu1 %vm71_vm3, %v326_v20 }
 0x2b3   :  { %v314_v21 = vpop.f32.mrf.mxu0 }
 0x2b4   :  { %v315_v22 = vadd.f32 %v503_v14, %v314_v21 }
 0x2b6   :  { %v327_v23 = vmax.f32 %v315_v22, 0.0 }
 0x2b8   :  { %490 = vmatmul.msk.f32.gmra.mxu1 %vm71_vm3, %v327_v23 }
 0x2bb   :  { %v317_v24 = vpop.f32.mrf.mxu0 }
 0x2bc   :  { %v318_v25 = vadd.f32 %v503_v14, %v317_v24 }
 0x2be   :  { %v328_v26 = vmax.f32 %v318_v25, 0.0 }
 0x2c0   :  { %491 = vmatmul.msk.f32.gmra.mxu1 %vm71_vm3, %v328_v26 }
 0x2c3   :  { %v320_v27 = vpop.f32.mrf.mxu0 }
 0x2c4   :  { %v321_v28 = vadd.f32 %v503_v14, %v320_v27 }
 0x2c6   :  { %v329_v29 = vmax.f32 %v321_v28, 0.0 }
 0x2c8   :  { %492 = vmatmul.msk.f32.gmra.mxu1 %vm71_vm3, %v329_v29 }
 0x2cb   :  { %v323_v30 = vpop.f32.mrf.mxu0 }
 0x2cc   :  { %v324_v32 = vadd.f32 %v503_v14, %v323_v30 }
 0x2ce   :  { %v330_v33 = vmax.f32 %v324_v32, 0.0 }
 0x2d0   :  { %493 = vmatmul.msk.f32.gmra.mxu1 %vm71_vm3, %v330_v33 }
 0x32d   :  { %v371_v31 = vpop.f32.mrf.mxu1 }
 0x32e   :  { %v372_v41 = vadd.f32 %v504_v36, %v371_v31 }
 0x335   :  { %v374_v34 = vpop.f32.mrf.mxu1 }
 0x336   :  { %v375_v40 = vadd.f32 %v504_v36, %v374_v34 }
 0x33d   :  { %v377_v35 = vpop.f32.mrf.mxu1 }
 0x33e   :  { %v378_v39 = vadd.f32 %v504_v36, %v377_v35 }
 0x345   :  { %v380_v37 = vpop.f32.mrf.mxu1 }
 0x346   :  { %v381_v38 = vadd.f32 %v504_v36, %v380_v37 }
 0x348   :  { %403 = vmatpush.msra.mxu2 %v381_v38 }
 0x34a   :  { %404 = vmatpush.msra.mxu2 %v378_v39 }
 0x34c   :  { %405 = vmatpush.msra.mxu2 %v375_v40 }
 0x34d   :  { %v383_v56 = vpop.f32.mrf.mxu1 }
 0x34e   :  { %406 = vmatpush.msra.mxu2 %v372_v41  ;;  %v384_v58 = vadd.f32 %v504_v36, %v383_v56 }
 0x34f   :  { %494 = vmatmul.msk.f32.vlgmr.msra.gmra.mxu2 %vm387_vm7, %v211_v42 }
 0x350   :  { %433 = vmatpush.msrb.mxu2 %v414_v43  ;;  %v386_v61 = vperm.slane %v384_v58, 0 }
 0x352   :  { %434 = vmatpush.msrb.mxu2 %v413_v44 }
 0x354   :  { %435 = vmatpush.msrb.mxu2 %v412_v45 }
 0x356   :  { %436 = vmatpush.msrb.mxu2 %v411_v46 }
 0x357   :  { %495 = vmatmul.msk.f32.vlgmr.msrb.gmra.mxu2 %vm387_vm7, %v416_v47 }
 0x3d2   :  { %v408_v48 = vpop.f32.mrf.mxu2 }
 0x3d3   :  { %v409_v3 = vadd.f32 %v408_v48, %v386_v61 }
 0x3da   :  { %v438_v50 = vpop.f32.mrf.mxu2 }
 0x3db   :  { %v439_v51 = vadd.f32 %v505_v49, %v438_v50 }
 0x3dd   :  { %v441_v52 = vadd.f32 1e-10, %v439_v51 }
 0x3df   :  { %508 = vrsqrt.f32 %v441_v52  ;;  %vm449_vm8 = vcmp.eq.f32.partialorder %v441_v52, inf  ;;  %v452_v63 = vand.u32 2147483648, %v441_v52  ;;  %vm451_vm9 = vcmp.eq.f32.partialorder %v441_v52, 0.0 }
 0x3e5   :  { %v509_v53 = vpop.eup %508 }
 0x3e6   :  { %v443_v54 = vmul.f32 %v509_v53, %v441_v52 }
 0x3e8   :  { %v444_v55 = vmul.f32 %v509_v53, %v443_v54 }
 0x3ea   :  { %v445_v57 = vmul.f32 0.5, %v444_v55 }
 0x3ec   :  { %v446_v59 = vsub.f32 1.5, %v445_v57 }
 0x3ee   :  { %v447_v60 = vmul.f32 %v509_v53, %v446_v59 }
 0x3f0   :  { %v448_v62 = vmul.f32 %v447_v60, %v441_v52 }
 0x3f2   :  { %v450_v1 = vsel %vm449_vm8, %v441_v52, %v448_v62 }
 0x3f3   :  { %v453_v2 = vsel %vm451_vm9, %v452_v63, %v450_v1 }
 0x3f4   :  { %v458_v4 = vmul.f32 %v456_v0, %v453_v2 }
 0x3f6   :  { %v459_v5 = vadd.f32 %v458_v4, %v409_v3 }
 0x3f8   :  { %460 = vst [vmem:[%s684_s4] sm:$0x3] %v459_v5 }

</bundles_post_ra>
